<compile_context>
chip_gen: v6e
topology: v6e:2x2x1
jax: 0.10.0
libtpu: 0.0.40
codegen_flags: <defaults>
</compile_context>

<pallas_src>
import functools
import math

import jax
import jax.numpy as jnp
from jax.experimental import pallas as pl
from jax.experimental.pallas import tpu as pltpu

LEAK = 0.2                  # nn.LeakyReLU(0.2)
EPS = 1e-5                  # nn.InstanceNorm2d default eps
INV_SQRT2 = 1.0 / math.sqrt(2.0)
LANE = 128


def _round_up(x, m):
    return (x + m - 1) // m * m


def _tile(m, target):
    """Pick (tile, m_padded): tile is a multiple of 8, m_padded % tile == 0.

    Prefers an exact divisor of m in (target/2, target]; otherwise pads m up to
    a multiple of `target` (junk rows are zeroed / cropped by the callers).
    """
    m8 = _round_up(m, 8)
    if m8 <= target:
        return m8, m8
    t0 = _round_up(target, 8)
    for t in range(t0, max(t0 // 2, 8) - 1, -8):
        if m % t == 0:
            return t, m
    return t0, _round_up(m, t0)


def _cparams(semantics, vmem_bytes):
    return pltpu.CompilerParams(
        dimension_semantics=semantics,
        vmem_limit_bytes=int(min(max(vmem_bytes, 32 << 20), 100 << 20)))


# ----------------------------- Pallas kernels -----------------------------

def _conv3x3_kernel(x_ref, w_ref, b_ref, *refs, taps, tm, fuse_sc):
    """Fused-im2col 3x3 conv tile (local accumulator, single output store).

    x_ref : (1, S, Cin)  bf16  whole padded image (resident across co/m axes)
    w_ref : (9, Cin, TN) bf16  weight taps (resident across m axis)
    b_ref : (1, TN)      f32
    [sc_ref: (1, TM, TN) bf16] shortcut tile (conv2 only)
    o_ref : (1, TM, TN)  out dtype
    """
    if fuse_sc:
        sc_ref, o_ref = refs
    else:
        (o_ref,) = refs

    base = pl.multiple_of(pl.program_id(2) * tm, 8)

    def tap(t):
        return jnp.dot(x_ref[0, pl.ds(base + taps[t], tm), :], w_ref[t],
                       preferred_element_type=jnp.float32)

    acc = tap(0)
    for t in range(1, 9):
        acc = acc + tap(t)

    res = acc + b_ref[...]
    if fuse_sc:                            # fused (conv2 + shortcut) / sqrt(2)
        res = (res + sc_ref[0].astype(jnp.float32)) * INV_SQRT2
    o_ref[0] = res.astype(o_ref.dtype)


def _matmul_kernel(x_ref, w_ref, o_ref):
    # 1x1 conv (no bias): (TM, Cin) @ (Cin, TN) -> (TM, TN)
    o_ref[...] = jnp.dot(x_ref[...], w_ref[...],
                         preferred_element_type=jnp.float32).astype(o_ref.dtype)


def _instnorm_stats_kernel(x_ref, s_ref, *, inv_hw):
    # Pass 1: accumulate per-channel sum / sumsq over HW chunks; finalize to
    # (mean, rstd).  Zero-padded HW rows contribute nothing (divide by true HW).
    k = pl.program_id(2)
    x = x_ref[0].astype(jnp.float32)                      # (THW, TC)
    part = jnp.concatenate(
        [jnp.sum(x, axis=0, keepdims=True),
         jnp.sum(x * x, axis=0, keepdims=True)], axis=0)  # (2, TC)

    @pl.when(k == 0)
    def _():
        s_ref[...] = jnp.zeros_like(s_ref)

    s_ref[0] += part

    @pl.when(k == pl.num_programs(2) - 1)
    def _():
        s = s_ref[0]
        mean = s[0:1, :] * inv_hw
        var = jnp.maximum(s[1:2, :] * inv_hw - mean * mean, 0.0)
        s_ref[0] = jnp.concatenate([mean, jax.lax.rsqrt(var + EPS)], axis=0)


def _instnorm_apply_kernel(x_ref, s_ref, g_ref, b_ref, o_ref):
    # Pass 2: normalize + affine + fused LeakyReLU(0.2); bf16 output.
    x = x_ref[0].astype(jnp.float32)
    s = s_ref[0]                                          # (2, TC): mean, rstd
    y = (x - s[0:1, :]) * (s[1:2, :] * g_ref[...]) + b_ref[...]
    o_ref[0] = jnp.where(y >= 0, y, LEAK * y).astype(o_ref.dtype)


# ----------------------------- wrappers -----------------------------------

def conv3x3(x, w9, b, *, pre_act=False, shortcut=None,
            out_dtype=jnp.float32, tm_target=256):
    """3x3 conv, pad=1, stride=1 on channel-padded NHWC input.

    x        : (N, H, W, Cin)  f32/bf16  (Cin multiple of 128)
    w9       : (9, Cin, Cout)  bf16      (Cout multiple of 128)
    b        : (1, Cout)       f32
    pre_act  : apply LeakyReLU(0.2) to the input (fused into the pad/cast pass)
    shortcut : optional (N, H, W, Cout) -> fuses (conv + b + sc) / sqrt(2)
    """
    N, H, W, Cin = x.shape
    Cout = w9.shape[2]
    Wp = W + 2                       # width incl. zero pad columns
    M = H * Wp                       # flat output rows (last 2 cols/row = junk)

    TN = 256 if Cout % 256 == 0 else LANE
    TM, Mp = _tile(M, tm_target if TN == LANE else 128)

    if pre_act:                      # LeakyReLU(0)=0, so activating pre-pad is exact
        x = jnp.where(x >= 0, x, LEAK * x)
    xp = jnp.pad(x.astype(jnp.bfloat16), ((0, 0), (1, 2), (1, 1), (0, 0)))
    S = (H + 3) * Wp
    xf = xp.reshape(N, S, Cin)
    S_need = Mp + 2 * Wp + 2         # max tap offset is 2*Wp + 2
    if S_need > S:
        xf = jnp.pad(xf, ((0, 0), (0, S_need - S), (0, 0)))
        S = S_need

    taps = tuple(kh * Wp + kw for kh in range(3) for kw in range(3))
    grid = (N, Cout // TN, Mp // TM)

    in_specs = [
        pl.BlockSpec((1, S, Cin), lambda n, co, m: (n, 0, 0)),    # resident per n
        pl.BlockSpec((9, Cin, TN), lambda n, co, m: (0, 0, co)),  # resident per co
        pl.BlockSpec((1, TN), lambda n, co, m: (0, co)),
    ]
    args = [xf, w9, b]
    fuse_sc = shortcut is not None
    if fuse_sc:
        scf = jnp.pad(shortcut.astype(jnp.bfloat16),
                      ((0, 0), (0, 0), (0, 2), (0, 0)))           # W -> Wp
        scf = scf.reshape(N, M, Cout)
        if Mp != M:
            scf = jnp.pad(scf, ((0, 0), (0, Mp - M), (0, 0)))
        in_specs.append(pl.BlockSpec((1, TM, TN), lambda n, co, m: (n, m, co)))
        args.append(scf)

    kernel = functools.partial(_conv3x3_kernel, taps=taps, tm=TM, fuse_sc=fuse_sc)

    osz = jnp.dtype(out_dtype).itemsize
    vmem = (2 * S * Cin * 2 + 2 * 9 * Cin * TN * 2 + 2 * TN * 4
            + 2 * TM * TN * osz + (2 * TM * TN * 2 if fuse_sc else 0) + (2 << 20))
    bytes_accessed = (N * S * Cin * 2 + 9 * Cin * Cout * 2 + N * Mp * Cout * osz
                      + (N * Mp * Cout * 2 if fuse_sc else 0))

    out = pl.pallas_call(
        kernel,
        out_shape=jax.ShapeDtypeStruct((N, Mp, Cout), out_dtype),
        grid=grid,
        in_specs=in_specs,
        out_specs=pl.BlockSpec((1, TM, TN), lambda n, co, m: (n, m, co)),
        compiler_params=_cparams(("parallel", "parallel", "parallel"), vmem),
        cost_estimate=pl.CostEstimate(
            flops=2 * N * Mp * 9 * Cin * Cout, transcendentals=0,
            bytes_accessed=int(bytes_accessed)),
    )(*args)

    # crop junk rows, reshape to (N, H, Wp, Cout), crop junk right-pad columns
    return out[:, :M].reshape(N, H, Wp, Cout)[:, :, :W, :]


def conv1x1(x, w, *, out_dtype=jnp.bfloat16, tm_target=256):
    """1x1 conv (no bias) on channel-padded NHWC input; bf16 output by default."""
    N, H, W, Cin = x.shape
    Cout = w.shape[1]
    M = N * H * W
    TN = 256 if Cout % 256 == 0 else LANE
    TM, Mp = _tile(M, tm_target)
    xf = x.reshape(M, Cin).astype(jnp.bfloat16)
    if Mp != M:
        xf = jnp.pad(xf, ((0, Mp - M), (0, 0)))
    osz = jnp.dtype(out_dtype).itemsize
    out = pl.pallas_call(
        _matmul_kernel,
        out_shape=jax.ShapeDtypeStruct((Mp, Cout), out_dtype),
        grid=(Mp // TM, Cout // TN),
        in_specs=[pl.BlockSpec((TM, Cin), lambda m, co: (m, 0)),
                  pl.BlockSpec((Cin, TN), lambda m, co: (0, co))],
        out_specs=pl.BlockSpec((TM, TN), lambda m, co: (m, co)),
        compiler_params=_cparams(
            ("parallel", "parallel"),
            2 * TM * Cin * 2 + 2 * Cin * TN * 2 + 2 * TM * TN * osz + (2 << 20)),
        cost_estimate=pl.CostEstimate(
            flops=2 * Mp * Cin * Cout, transcendentals=0,
            bytes_accessed=Mp * Cin * 2 + Cin * Cout * 2 + Mp * Cout * osz),
    )(xf, w)
    return out[:M].reshape(N, H, W, Cout)


def instnorm_act(x, gamma, beta):
    """InstanceNorm2d(affine=True) + LeakyReLU(0.2), tiled over (N, C/128, HW).

    Two passes (stats accumulation, normalize) so VMEM use does not scale with
    the whole feature map.  Returns bf16 NHWC.
    """
    N, H, W, C = x.shape
    HW = H * W
    TC = LANE
    THW, HWp = _tile(HW, 512)
    K = HWp // THW
    xr = x.reshape(N, HW, C)
    if HWp != HW:
        xr = jnp.pad(xr, ((0, 0), (0, HWp - HW), (0, 0)))
    isz = jnp.dtype(xr.dtype).itemsize

    stats = pl.pallas_call(
        functools.partial(_instnorm_stats_kernel, inv_hw=1.0 / HW),
        out_shape=jax.ShapeDtypeStruct((N, 2, C), jnp.float32),
        grid=(N, C // TC, K),
        in_specs=[pl.BlockSpec((1, THW, TC), lambda n, c, k: (n, k, c))],
        out_specs=pl.BlockSpec((1, 2, TC), lambda n, c, k: (n, 0, c)),
        compiler_params=_cparams(("parallel", "parallel", "arbitrary"),
                                 2 * THW * TC * isz + 4 * 2 * TC * 4 + (1 << 20)),
        cost_estimate=pl.CostEstimate(
            flops=3 * N * HWp * C, transcendentals=N * C,
            bytes_accessed=N * HWp * C * isz + N * 2 * C * 4),
    )(xr)

    out = pl.pallas_call(
        _instnorm_apply_kernel,
        out_shape=jax.ShapeDtypeStruct((N, HWp, C), jnp.bfloat16),
        grid=(N, C // TC, K),
        in_specs=[pl.BlockSpec((1, THW, TC), lambda n, c, k: (n, k, c)),
                  pl.BlockSpec((1, 2, TC), lambda n, c, k: (n, 0, c)),
                  pl.BlockSpec((1, TC), lambda n, c, k: (0, c)),
                  pl.BlockSpec((1, TC), lambda n, c, k: (0, c))],
        out_specs=pl.BlockSpec((1, THW, TC), lambda n, c, k: (n, k, c)),
        compiler_params=_cparams(("parallel", "parallel", "parallel"),
                                 2 * THW * TC * (isz + 2) + 12 * TC * 4 + (1 << 20)),
        cost_estimate=pl.CostEstimate(
            flops=6 * N * HWp * C, transcendentals=0,
            bytes_accessed=N * HWp * C * (isz + 2) + N * 2 * C * 4),
    )(xr, stats, gamma, beta)

    if HWp != HW:
        out = out[:, :HW]
    return out.reshape(N, H, W, C)


def avg_pool2(x):
    # F.avg_pool2d(x, 2) in NHWC.  TODO(synk): fold into the consumer kernel.
    N, H, W, C = x.shape
    return x.reshape(N, H // 2, 2, W // 2, 2, C).mean(axis=(2, 4))


def upsample_nearest2(x):
    # F.interpolate(scale_factor=2, mode='nearest') in NHWC.
    # TODO(synk): fold into the conv input index_map.
    return jnp.repeat(jnp.repeat(x, 2, axis=1), 2, axis=2)


# ------------------------------- the module --------------------------------

class ResBlkPallas:
    def __init__(self, key, dim_in, dim_out, normalize=False,
                 downsample=False, upsample=False):
        self.dim_in = dim_in
        self.dim_out = dim_out
        self.normalize = normalize
        self.downsample = downsample
        self.upsample = upsample
        self.learned_sc = dim_in != dim_out
        self.cp_in = _round_up(dim_in, LANE)
        self.cp_out = _round_up(dim_out, LANE)

        ks = jax.random.split(key, 9)

        def conv_w(k, co, ci, kh, kw):
            fan = ci * kh * kw
            return jax.random.normal(k, (co, ci, kh, kw), jnp.float32) / math.sqrt(fan)

        # f32 OIHW params (kept for the pure-JAX reference).
        self.w1 = conv_w(ks[0], dim_in, dim_in, 3, 3)
        self.b1 = 0.1 * jax.random.normal(ks[1], (dim_in,), jnp.float32)
        self.w2 = conv_w(ks[2], dim_out, dim_in, 3, 3)
        self.b2 = 0.1 * jax.random.normal(ks[3], (dim_out,), jnp.float32)
        if normalize:
            self.g1 = 1.0 + 0.1 * jax.random.normal(ks[4], (dim_in,), jnp.float32)
            self.bt1 = 0.1 * jax.random.normal(ks[5], (dim_in,), jnp.float32)
            self.g2 = 1.0 + 0.1 * jax.random.normal(ks[6], (dim_in,), jnp.float32)
            self.bt2 = 0.1 * jax.random.normal(ks[7], (dim_in,), jnp.float32)
        if self.learned_sc:
            self.w_sc = conv_w(ks[8], dim_out, dim_in, 1, 1)

        # Kernel-ready params: pre-transposed / channel-padded / bf16 weights,
        # padded f32 biases & affine params -- done once here, not per call.
        self.w1p = self._prep_w3(self.w1, self.cp_in, self.cp_in)
        self.b1p = self._prep_vec(self.b1, self.cp_in)
        self.w2p = self._prep_w3(self.w2, self.cp_in, self.cp_out)
        self.b2p = self._prep_vec(self.b2, self.cp_out)
        if normalize:
            self.g1p = self._prep_vec(self.g1, self.cp_in)
            self.bt1p = self._prep_vec(self.bt1, self.cp_in)
            self.g2p = self._prep_vec(self.g2, self.cp_in)
            self.bt2p = self._prep_vec(self.bt2, self.cp_in)
        if self.learned_sc:
            wsc = self.w_sc.reshape(dim_out, dim_in).T                 # (Cin, Cout)
            wsc = jnp.pad(wsc, ((0, self.cp_in - dim_in),
                                (0, self.cp_out - dim_out)))
            self.w_scp = wsc.astype(jnp.bfloat16)

    @staticmethod
    def _prep_w3(w_oihw, cp_in, cp_out):
        co, ci = w_oihw.shape[0], w_oihw.shape[1]
        w = jnp.transpose(w_oihw, (2, 3, 1, 0)).reshape(9, ci, co)     # tap-major
        w = jnp.pad(w, ((0, 0), (0, cp_in - ci), (0, cp_out - co)))
        return w.astype(jnp.bfloat16)

    @staticmethod
    def _prep_vec(v, cp):
        return jnp.pad(v, (0, cp - v.shape[0])).reshape(1, cp).astype(jnp.float32)

    def _shortcut(self, x):          # channel-padded NHWC
        if self.upsample and self.downsample:
            # degenerate combo (unused in StarGAN-v2): keep the original order.
            x = upsample_nearest2(x)
            if self.learned_sc:
                x = conv1x1(x, self.w_scp)
            return avg_pool2(x)
        # 1x1 conv commutes exactly with avg-pool / nearest-upsample, so run it
        # on the low-resolution side (4x fewer pixels through the matmul).
        if self.upsample and not self.learned_sc:
            x = upsample_nearest2(x)
        if self.downsample:
            x = avg_pool2(x)
        if self.learned_sc:
            x = conv1x1(x, self.w_scp)                      # bf16 output
            if self.upsample:
                x = upsample_nearest2(x)
        return x

    def __call__(self, x_nchw):
        x = jnp.transpose(x_nchw, (0, 2, 3, 1)).astype(jnp.float32)     # NHWC
        x = jnp.pad(x, ((0, 0), (0, 0), (0, 0), (0, self.cp_in - self.dim_in)))

        sc = self._shortcut(x)

        h = x
        if self.normalize:
            h = instnorm_act(h, self.g1p, self.bt1p)         # norm1 + actv, bf16
        if self.upsample:
            # nearest-upsample commutes with the elementwise activation, so the
            # pre-conv1 LeakyReLU (no-norm case) stays fused into conv1's pad/cast.
            h = upsample_nearest2(h)
        h = conv3x3(h, self.w1p, self.b1p, pre_act=not self.normalize,
                    out_dtype=(jnp.float32 if self.normalize else jnp.bfloat16))
        if self.downsample:
            h = avg_pool2(h)
        if self.normalize:
            h = instnorm_act(h, self.g2p, self.bt2p)         # norm2 + actv, bf16
        # conv2 fuses: optional pre-activation, bias, shortcut add, 1/sqrt(2).
        out = conv3x3(h, self.w2p, self.b2p, pre_act=not self.normalize,
                      shortcut=sc, out_dtype=jnp.float32)
        out = out[..., :self.dim_out]                        # crop channel padding
        return jnp.transpose(out, (0, 3, 1, 2))              # NHWC -> NCHW


# ------------------------- pure-JAX reference (NCHW) ------------------------

def _ref_forward(blk, x):
    def conv(t, w, b=None, pad=0):
        y = jax.lax.conv_general_dilated(
            t, w, (1, 1), ((pad, pad), (pad, pad)),
            dimension_numbers=('NCHW', 'OIHW', 'NCHW'))
        if b is not None:
            y = y + b.reshape(1, -1, 1, 1)
        return y

    def inorm(t, g, bt):
        m = t.mean(axis=(2, 3), keepdims=True)
        v = ((t - m) ** 2).mean(axis=(2, 3), keepdims=True)
        return (t - m) / jnp.sqrt(v + EPS) * g.reshape(1, -1, 1, 1) + bt.reshape(1, -1, 1, 1)

    def lrelu(t):
        return jnp.where(t >= 0, t, LEAK * t)

    def pool(t):
        N, C, H, W = t.shape
        return t.reshape(N, C, H // 2, 2, W // 2, 2).mean(axis=(3, 5))

    def up(t):
        return jnp.repeat(jnp.repeat(t, 2, axis=2), 2, axis=3)

    s = x
    if blk.upsample:
        s = up(s)
    if blk.learned_sc:
        s = conv(s, blk.w_sc)
    if blk.downsample:
        s = pool(s)

    h = x
    if blk.normalize:
        h = inorm(h, blk.g1, blk.bt1)
    h = lrelu(h)
    if blk.upsample:
        h = up(h)
    h = conv(h, blk.w1, blk.b1, pad=1)
    if blk.downsample:
        h = pool(h)
    if blk.normalize:
        h = inorm(h, blk.g2, blk.bt2)
    h = lrelu(h)
    h = conv(h, blk.w2, blk.b2, pad=1)
    return (s + h) * INV_SQRT2


if __name__ == "__main__":
    key = jax.random.PRNGKey(0)
    kx, kp1, kp2 = jax.random.split(key, 3)
    x = jax.random.normal(kx, (2, 4, 16, 16), jnp.float32)

    # Config 1: learned shortcut, instance norm, downsample.
    blk1 = ResBlkPallas(kp1, 4, 8, normalize=True, downsample=True)
    y1 = jax.block_until_ready(blk1(x))
    assert y1.shape == (2, 8, 8, 8), y1.shape
    r1 = _ref_forward(blk1, x)
    err1 = float(jnp.max(jnp.abs(y1 - r1)))
    assert jnp.allclose(y1, r1, atol=1e-1, rtol=1e-1), err1

    # Config 2: identity shortcut, no norm, nearest-neighbour upsample.
    blk2 = ResBlkPallas(kp2, 4, 4, normalize=False, upsample=True)
    y2 = jax.block_until_ready(blk2(x))
    assert y2.shape == (2, 4, 32, 32), y2.shape
    r2 = _ref_forward(blk2, x)
    err2 = float(jnp.max(jnp.abs(y2 - r2)))
    assert jnp.allclose(y2, r2, atol=1e-1, rtol=1e-1), err2

    print("KERNEL_OK")
</pallas_src>

<mosaic_0001>
module attributes {stable_mosaic.version = 11 : i64} {
  func.func @_matmul_kernel(%arg0: i32, %arg1: i32, %arg2: memref<128x128xbf16, #tpu.memory_space<vmem>>, %arg3: memref<128x128xbf16, #tpu.memory_space<vmem>>, %arg4: memref<128x128xbf16, #tpu.memory_space<vmem>>) attributes {dimension_semantics = [#tpu.dimension_semantics<parallel>, #tpu.dimension_semantics<parallel>], iteration_bounds = array<i64: 1, 1>, scalar_prefetch = 0 : i64, scratch_operands = 0 : i64, tpu.core_type = #tpu.core_type<tc>, window_params = [{transform_indices = @transform_0, window_bounds = array<i64: 128, 128>}, {transform_indices = @transform_1, window_bounds = array<i64: 128, 128>}, {transform_indices = @transform_2, window_bounds = array<i64: 128, 128>}]} {
    %c0 = arith.constant 0 : index
    %c0_0 = arith.constant 0 : index
    %0 = vector.load %arg2[%c0, %c0_0] : memref<128x128xbf16, #tpu.memory_space<vmem>>, vector<128x128xbf16>
    %c0_1 = arith.constant 0 : index
    %c0_2 = arith.constant 0 : index
    %1 = vector.load %arg3[%c0_1, %c0_2] : memref<128x128xbf16, #tpu.memory_space<vmem>>, vector<128x128xbf16>
    %cst = arith.constant dense<0.000000e+00> : vector<128x128xf32>
    %2 = tpu.matmul %0, %1, %cst {dimension_numbers = #tpu.dot_dimension_numbers<[1], [0], [0], [1], [0, 0, 1, 1], [], []>} : vector<128x128xbf16>, vector<128x128xbf16>, vector<128x128xf32> -> vector<128x128xf32>
    %3 = arith.truncf %2 : vector<128x128xf32> to vector<128x128xbf16>
    %c0_3 = arith.constant 0 : index
    %c0_4 = arith.constant 0 : index
    %4 = vector.load %arg4[%c0_3, %c0_4] : memref<128x128xbf16, #tpu.memory_space<vmem>>, vector<128x128xbf16>
    tpu.vector_store %arg4[%c0_3, %c0_4], %3 {strides = array<i32>} : memref<128x128xbf16, #tpu.memory_space<vmem>>, vector<128x128xbf16>,
    return
  }
  func.func @transform_0(%arg0: i32, %arg1: i32) -> (i32, i32) {
    %c0_i32 = arith.constant 0 : i32
    %c0_i32_0 = arith.constant 0 : i32
    return %arg0, %c0_i32 : i32, i32
  }
  func.func @transform_1(%arg0: i32, %arg1: i32) -> (i32, i32) {
    %c0_i32 = arith.constant 0 : i32
    %c0_i32_0 = arith.constant 0 : i32
    return %c0_i32, %arg1 : i32, i32
  }
  func.func @transform_2(%arg0: i32, %arg1: i32) -> (i32, i32) {
    %c0_i32 = arith.constant 0 : i32
    return %arg0, %arg1 : i32, i32
  }
}

</mosaic_0001>

<bundles_post_ra>
// kernel: tpu_custom_call.1
= control target key start
LH: loop header
LB: loop body
LE: loop exit
PB: predicated region body
PF: predicated region fallthrough
CT: control target
= control target key end

     0   :  { %7 = vsyncpa [#allocation3], 0  ;;  %s648_s0 = inlined_call_operand.hbm [shape: bf16[128,128], index: 0, kind: input, shape index: {}]   ;;  %s649_s1 = inlined_call_operand.hbm [shape: bf16[128,128], index: 1, kind: input, shape index: {}]   ;;  %s650_s2 = inlined_call_operand.hbm [shape: bf16[128,128], index: 2, kind: output, shape index: {}]  }
   0x1   :  { %8 = vsyncpa [#allocation6], 0 }
   0x2   :  { %9 = vsyncpa [#allocation4], 0  ;;  %s610_s9 = smov [#allocation2]  }
   0x3   :  { %s15_s10 = sshll.u32 %s610_s9, 4  ;;  %s16_s10 = int_to_ptr.vmem [resolvable:$true] %s15_s10 }
   0x4   :  { %s552_s11 = scalar_lea.vmem %s16_s10, 1024  ;;  %p557_p1 = scmp.lt.s32.totalorder %s16_s10, %s16_s10 }
   0x5   :  { %p553_p0 = scmp.ne.s32.totalorder %s16_s10, %s552_s11  ;;  %p558_p2 = scmp.lt.s32.totalorder %s552_s11, %s552_s11 }
   0x7   :  { %p559_p3 = por %p558_p2, %p557_p1 }
   0x9   :  { %p560_p4 = pnand %p559_p3, %p553_p0 }
   0xb   :  { %563 = shalt.err (!%p560_p4)
}
   0xc   :  { %s611_s12 = smov 64   ;;  %s612_s13 = smov 4  }
   0xd   :  { %21 = dma.hbm_to_vmem [thread:$0]  %s648_s0, 1024, %s16_s10, [#allocation3], %s611_s12, %s611_s12, %s612_s13  }
   0xe   :  { %s613_s16 = smov [#allocation5]  }
   0xf   :  { %s27_s17 = sshll.u32 %s613_s16, 4  ;;  %s28_s17 = int_to_ptr.vmem [resolvable:$true] %s27_s17 }
  0x10   :  { %s572_s18 = scalar_lea.vmem %s28_s17, 1024  ;;  %p577_p6 = scmp.lt.s32.totalorder %s28_s17, %s28_s17 }
  0x11   :  { %p573_p5 = scmp.ne.s32.totalorder %s28_s17, %s572_s18  ;;  %p578_p7 = scmp.lt.s32.totalorder %s572_s18, %s572_s18 }
  0x13   :  { %p579_p8 = por %p578_p7, %p577_p6 }
  0x15   :  { %p580_p9 = pnand %p579_p8, %p573_p5 }
  0x17   :  { %583 = shalt.err (!%p580_p9)
}
  0x18   :  { %33 = dma.hbm_to_vmem [thread:$0]  %s649_s1, 1024, %s28_s17, [#allocation6], %s611_s12, %s611_s12, %s612_s13  }
  0x19   :  { %604 = dma.done.wait [#allocation3], 1024  }
  0x1a   :  { %605 = vsyncadd [#allocation3], 4294966272 }
  0x1b   :  { %606 = dma.done.wait [#allocation6], 1024  }
  0x1c   :  { %607 = vsyncadd [#allocation6], 4294966272  ;;  %v528_v0 = vld [vmem:[#allocation5 + $0x38] sm:$0xff]   ;;  %v529_v1 = vld [vmem:[#allocation5 + $0x30] sm:$0xff]   ;;  %s614_s0 = smov [#allocation7]  }
  0x1d   :  { %475 = vmatprep.subr.bf16.mxu0 %v528_v0  ;;  %507 = vmatprep.subr.bf16.mxu1 %v528_v0  ;;  %v530_v2 = vld [vmem:[#allocation5 + $0x28] sm:$0xff]   ;;  %v531_v3 = vld [vmem:[#allocation5 + $0x20] sm:$0xff]   ;;  %v532_v6 = vld [vmem:[#allocation5 + $0x18] sm:$0xff]   ;;  %s351_s1 = sshll.u32 %s614_s0, 4  ;;  %s352_s1 = int_to_ptr.vmem [resolvable:$true] %s351_s1 }
  0x1e   :  { %476 = vmatpush3.bf16.msra.mxu0 %v528_v0  ;;  %515 = vmatpush3.bf16.msra.mxu1 %v528_v0  ;;  %v536_v4 = vld [vmem:[#allocation2] sm:$0xff]   ;;  %v533_v7 = vld [vmem:[#allocation5 + $0x10] sm:$0xff]   ;;  %v534_v8 = vld [vmem:[#allocation5 + $0x8] sm:$0xff]   ;;  %s584_s21 = scalar_lea.vmem %s352_s1, 1024  ;;  %p589_p11 = scmp.lt.s32.totalorder %s352_s1, %s352_s1 }
  0x1f   :  { %477 = vmatprep.subr.bf16.mxu0 %v529_v1  ;;  %508 = vmatprep.subr.bf16.mxu1 %v529_v1  ;;  %v537_v5 = vld [vmem:[#allocation2 + $0x20] sm:$0xff]   ;;  %v538_v10 = vld [vmem:[#allocation2 + $0x8] sm:$0xff]   ;;  %v540_v12 = vld [vmem:[#allocation2 + $0x10] sm:$0xff]   ;;  %p585_p10 = scmp.ne.s32.totalorder %s352_s1, %s584_s21  ;;  %p590_p12 = scmp.lt.s32.totalorder %s584_s21, %s584_s21 }
  0x20   :  { %491 = vmatprep.mubr.bf16.mxu0 %v536_v4  ;;  %499 = vmatprep.mubr.bf16.mxu1 %v537_v5  ;;  %v535_v9 = vld [vmem:[#allocation5] sm:$0xff]   ;;  %v539_v11 = vld [vmem:[#allocation2 + $0x28] sm:$0xff]   ;;  %v541_v13 = vld [vmem:[#allocation2 + $0x30] sm:$0xff]  }
  0x21   :  { %v542_v14 = vld [vmem:[#allocation2 + $0x18] sm:$0xff]   ;;  %p591_p13 = por %p590_p12, %p589_p11 }
  0x22   :  { %478 = vmatpush3.bf16.msra.mxu0 %v529_v1  ;;  %516 = vmatpush3.bf16.msra.mxu1 %v529_v1  ;;  %v543_v15 = vld [vmem:[#allocation2 + $0x38] sm:$0xff]  }
  0x23   :  { %479 = vmatprep.subr.bf16.mxu0 %v530_v2  ;;  %509 = vmatprep.subr.bf16.mxu1 %v530_v2  ;;  %p592_p0 = pnand %p591_p13, %p585_p10 }
  0x26   :  { %480 = vmatpush3.bf16.msra.mxu0 %v530_v2  ;;  %517 = vmatpush3.bf16.msra.mxu1 %v530_v2 }
  0x27   :  { %481 = vmatprep.subr.bf16.mxu0 %v531_v3  ;;  %510 = vmatprep.subr.bf16.mxu1 %v531_v3 }
  0x2a   :  { %482 = vmatpush3.bf16.msra.mxu0 %v531_v3  ;;  %518 = vmatpush3.bf16.msra.mxu1 %v531_v3 }
  0x2b   :  { %483 = vmatprep.subr.bf16.mxu0 %v532_v6  ;;  %511 = vmatprep.subr.bf16.mxu1 %v532_v6 }
  0x2e   :  { %484 = vmatpush3.bf16.msra.mxu0 %v532_v6  ;;  %519 = vmatpush3.bf16.msra.mxu1 %v532_v6 }
  0x2f   :  { %485 = vmatprep.subr.bf16.mxu0 %v533_v7  ;;  %512 = vmatprep.subr.bf16.mxu1 %v533_v7 }
  0x32   :  { %486 = vmatpush3.bf16.msra.mxu0 %v533_v7  ;;  %520 = vmatpush3.bf16.msra.mxu1 %v533_v7 }
  0x33   :  { %487 = vmatprep.subr.bf16.mxu0 %v534_v8  ;;  %513 = vmatprep.subr.bf16.mxu1 %v534_v8 }
  0x36   :  { %488 = vmatpush3.bf16.msra.mxu0 %v534_v8  ;;  %521 = vmatpush3.bf16.msra.mxu1 %v534_v8 }
  0x37   :  { %489 = vmatprep.subr.bf16.mxu0 %v535_v9  ;;  %514 = vmatprep.subr.bf16.mxu1 %v535_v9 }
  0x3a   :  { %490 = vmatpush3.bf16.msra.mxu0 %v535_v9  ;;  %522 = vmatpush3.bf16.msra.mxu1 %v535_v9 }
  0x3d   :  { %492 = vmatmul.mubr.bf16.vlgmr.msra.gmra.mxu0 %v538_v10  ;;  %500 = vmatmul.mubr.bf16.vlgmr.msra.gmra.mxu1 %v539_v11 }
  0x3e   :  { %495 = vmatprep.mubr.bf16.mxu0 %v540_v12  ;;  %503 = vmatprep.mubr.bf16.mxu1 %v541_v13 }
  0x45   :  { %496 = vmatmul.mubr.bf16.gmra.mxu0 %v542_v14  ;;  %504 = vmatmul.mubr.bf16.gmra.mxu1 %v543_v15 }
  0xfd   :  { %v493_v16 = vpop.f32.mrf.mxu0  ;;  %v501_v17 = vpop.f32.mrf.mxu1 }
  0xff   :  { %v203_v18 = vpop.f32.mrf.mxu0  ;;  %v235_v19 = vpop.f32.mrf.mxu1 }
 0x101   :  { %v494_v20 = vpop.f32.mrf.mxu0  ;;  %v502_v21 = vpop.f32.mrf.mxu1 }
 0x102   :  { %v420_v22 = vpack.c.bf16 %v494_v20, %v493_v16  ;;  %v440_v23 = vpack.c.bf16 %v502_v21, %v501_v17 }
 0x103   :  { %v206_v24 = vpop.f32.mrf.mxu0  ;;  %v238_v25 = vpop.f32.mrf.mxu1 }
 0x104   :  { %452 = vst [vmem:[#allocation7 + $0x8] sm:$0xff] %v420_v22   ;;  %456 = vst [vmem:[#allocation7 + $0x28] sm:$0xff] %v440_v23   ;;  %v415_v26 = vpack.c.bf16 %v206_v24, %v203_v18  ;;  %v435_v27 = vpack.c.bf16 %v238_v25, %v235_v19 }
 0x105   :  { %v497_v28 = vpop.f32.mrf.mxu0  ;;  %v505_v29 = vpop.f32.mrf.mxu1 }
 0x106   :  { %416 = vst [vmem:[#allocation7] sm:$0xff] %v415_v26   ;;  %455 = vst [vmem:[#allocation7 + $0x20] sm:$0xff] %v435_v27  }
 0x107   :  { %v219_v30 = vpop.f32.mrf.mxu0  ;;  %v251_v31 = vpop.f32.mrf.mxu1 }
 0x109   :  { %v498_v32 = vpop.f32.mrf.mxu0  ;;  %v506_v33 = vpop.f32.mrf.mxu1 }
 0x10a   :  { %v430_v34 = vpack.c.bf16 %v498_v32, %v497_v28  ;;  %v450_v35 = vpack.c.bf16 %v506_v33, %v505_v29 }
 0x10b   :  { %v222_v36 = vpop.f32.mrf.mxu0  ;;  %v254_v37 = vpop.f32.mrf.mxu1 }
 0x10c   :  { %454 = vst [vmem:[#allocation7 + $0x18] sm:$0xff] %v430_v34   ;;  %458 = vst [vmem:[#allocation7 + $0x38] sm:$0xff] %v450_v35   ;;  %v425_v38 = vpack.c.bf16 %v222_v36, %v219_v30  ;;  %v445_v39 = vpack.c.bf16 %v254_v37, %v251_v31 }
 0x10e   :  { %453 = vst [vmem:[#allocation7 + $0x10] sm:$0xff] %v425_v38   ;;  %457 = vst [vmem:[#allocation7 + $0x30] sm:$0xff] %v445_v39  }
 0x10f   :  { %595 = shalt.err (!%p592_p0)
}
 0x110   :  { %357 = dma.vmem_to_hbm [thread:$0]  %s352_s1, 1024, %s650_s2, [#allocation4], %s611_s12, %s611_s12, %s612_s13  }
 0x111   :  { %608 = dma.done.wait [#allocation4], 1024  }
 0x112   :  { %609 = vsyncadd [#allocation4], 4294966272 }
 0x113   :  { %361 = vsyncpa [#allocation3], 1 }
 0x114   :  { %362 = vsyncpa [#allocation6], 1 }
 0x115   :  { %363 = vsyncpa [#allocation4], 1 }

</bundles_post_ra>
